<compile_context>
chip_gen: v6e
topology: v6e:2x2x1
jax: 0.10.0
libtpu: 0.0.40
codegen_flags: <defaults>
</compile_context>

<pallas_src>
import jax
import jax.numpy as jnp
from jax import lax
from jax.experimental import pallas as pl
from jax.experimental.pallas import tpu as pltpu

_EPS = 1e-12           # matches torch.nn.functional.normalize default eps
_MAX_TILE_N = 32768    # ~12.6 MiB double-buffered VMEM -> fits all gens' defaults
_SMALL_N_THRESHOLD = 1 << 17  # below this, fused XLA elementwise beats kernel launch


def _brdf_normalize_kernel(v_ref, n_ref, l_ref, vo_ref, no_ref, lo_ref):
    """Normalize each (C, tile_n) block along axis 0 (the C axis)."""

    def _l2_normalize(x):
        # sum of squares via explicit (1, tile_n) row slices: pure VPU adds,
        # no cross-sublane reduce over the 8-padded sublane vreg.
        c = x.shape[0]
        sumsq = x[0:1, :] * x[0:1, :]
        for r in range(1, c):
            sumsq = sumsq + x[r:r + 1, :] * x[r:r + 1, :]
        # max(sqrt(s), eps) == sqrt(max(s, eps^2)); rsqrt runs on the EUP slot.
        inv = lax.rsqrt(jnp.maximum(sumsq, _EPS * _EPS))
        return x * inv

    vo_ref[...] = _l2_normalize(v_ref[...])
    no_ref[...] = _l2_normalize(n_ref[...])
    lo_ref[...] = _l2_normalize(l_ref[...])


def _jnp_normalize(x):
    nrm = jnp.sqrt(jnp.sum(x * x, axis=0, keepdims=True))
    return x / jnp.maximum(nrm, _EPS)


def _reference(view_dir, normal, light_dir):
    return (_jnp_normalize(view_dir),
            _jnp_normalize(normal),
            _jnp_normalize(light_dir))


def _round_up(x, m):
    return ((x + m - 1) // m) * m


def _default_tile_n(n):
    n_pad128 = _round_up(n, 128)
    t = min(_MAX_TILE_N, n_pad128)
    # Keep >= 2 grid steps when possible so the "parallel" grid axis can be
    # sharded across v7x's two TensorCores.
    if t == n_pad128 and n_pad128 >= 256:
        t = _round_up(n_pad128 // 2, 128)
    return max(t, 128)


def brdf_model_forward(view_dir, normal, light_dir, *, tile_n=None,
                       use_pallas=None):
    """Pallas implementation of BRDFModel.forward.

    Args:
      view_dir, normal, light_dir: float32 arrays of shape (C, N).
      tile_n: optional lane-tile override (multiple of 128).
      use_pallas: force/skip the Pallas path (None = auto by problem size).
    Returns:
      Tuple of the three L2-normalized (along axis 0) arrays.
    """
    c, n = view_dir.shape
    assert normal.shape == (c, n) and light_dir.shape == (c, n)

    if use_pallas is None:
        use_pallas = n >= _SMALL_N_THRESHOLD
    if not use_pallas:
        # Launch + pipeline overhead dwarfs the work at small N.
        return _reference(view_dir, normal, light_dir)

    if tile_n is None:
        tile_n = _default_tile_n(n)
    assert tile_n % 128 == 0, "tile_n must be a multiple of the 128-lane width"

    # Pad N up to a multiple of tile_n; padded zero columns normalize to 0.
    n_pad = _round_up(n, tile_n)
    if n_pad != n:
        pad = ((0, 0), (0, n_pad - n))
        view_dir_p = jnp.pad(view_dir, pad)
        normal_p = jnp.pad(normal, pad)
        light_dir_p = jnp.pad(light_dir, pad)
    else:
        view_dir_p, normal_p, light_dir_p = view_dir, normal, light_dir

    grid = (n_pad // tile_n,)
    blk = pl.BlockSpec((c, tile_n), lambda i: (0, i))
    out_sd = jax.ShapeDtypeStruct((c, n_pad), view_dir.dtype)

    elem_bytes = jnp.dtype(view_dir.dtype).itemsize
    cost = pl.CostEstimate(
        flops=3 * 3 * c * n_pad,            # 3 arrays x (mul+add per row + scale)
        transcendentals=3 * n_pad,          # one rsqrt per column per array
        bytes_accessed=2 * 3 * c * n_pad * elem_bytes,
    )

    outs = pl.pallas_call(
        _brdf_normalize_kernel,
        out_shape=(out_sd, out_sd, out_sd),
        grid_spec=pltpu.PrefetchScalarGridSpec(
            num_scalar_prefetch=0,
            grid=grid,
            in_specs=[blk, blk, blk],
            out_specs=[blk, blk, blk],
        ),
        compiler_params=pltpu.CompilerParams(
            dimension_semantics=("parallel",),
        ),
        cost_estimate=cost,
    )(view_dir_p, normal_p, light_dir_p)

    if n_pad != n:
        outs = tuple(o[:, :n] for o in outs)
    return outs


if __name__ == "__main__":
    key = jax.random.PRNGKey(0)
    k1, k2, k3 = jax.random.split(key, 3)

    # Small demo shapes: 3-component direction vectors for 300 rays.
    # N=300 is deliberately not a multiple of 128 to exercise the padding
    # path, and the default tile chooser yields >= 2 grid steps.
    C, N = 3, 300
    view_dir = jax.random.normal(k1, (C, N), dtype=jnp.float32)
    normal = jax.random.normal(k2, (C, N), dtype=jnp.float32)
    light_dir = jax.random.normal(k3, (C, N), dtype=jnp.float32)

    # Force the Pallas path so the kernel itself is exercised at demo size.
    outs = brdf_model_forward(view_dir, normal, light_dir, use_pallas=True)
    outs = jax.block_until_ready(outs)

    refs = _reference(view_dir, normal, light_dir)
    for o, r in zip(outs, refs):
        assert o.shape == r.shape
        assert jnp.allclose(o, r, atol=1e-5, rtol=1e-5), "mismatch vs reference"

    # Also sanity-check the small-N auto-dispatch (pure-jnp fallback).
    outs_small = brdf_model_forward(view_dir, normal, light_dir)
    outs_small = jax.block_until_ready(outs_small)
    for o, r in zip(outs_small, refs):
        assert jnp.allclose(o, r, atol=1e-6, rtol=1e-6)

    print("KERNEL_OK")
</pallas_src>

<mosaic_0001>
module attributes {stable_mosaic.version = 11 : i64} {
  func.func @_brdf_normalize_kernel(%arg0: i32, %arg1: memref<3x256xf32, #tpu.memory_space<vmem>>, %arg2: memref<3x256xf32, #tpu.memory_space<vmem>>, %arg3: memref<3x256xf32, #tpu.memory_space<vmem>>, %arg4: memref<3x256xf32, #tpu.memory_space<vmem>>, %arg5: memref<3x256xf32, #tpu.memory_space<vmem>>, %arg6: memref<3x256xf32, #tpu.memory_space<vmem>>) attributes {dimension_semantics = [#tpu.dimension_semantics<parallel>], iteration_bounds = array<i64: 2>, scalar_prefetch = 0 : i64, scratch_operands = 0 : i64, tpu.core_type = #tpu.core_type<tc>, window_params = [{transform_indices = @transform_0, window_bounds = array<i64: 3, 256>}, {transform_indices = @transform_1, window_bounds = array<i64: 3, 256>}, {transform_indices = @transform_2, window_bounds = array<i64: 3, 256>}, {transform_indices = @transform_3, window_bounds = array<i64: 3, 256>}, {transform_indices = @transform_4, window_bounds = array<i64: 3, 256>}, {transform_indices = @transform_5, window_bounds = array<i64: 3, 256>}]} {
    %c0 = arith.constant 0 : index
    %c0_0 = arith.constant 0 : index
    %0 = vector.load %arg1[%c0, %c0_0] : memref<3x256xf32, #tpu.memory_space<vmem>>, vector<3x256xf32>
    %1 = vector.extract_strided_slice %0 {offsets = [0, 0], sizes = [1, 256], strides = [1, 1]} : vector<3x256xf32> to vector<1x256xf32>
    %2 = vector.extract_strided_slice %0 {offsets = [0, 0], sizes = [1, 256], strides = [1, 1]} : vector<3x256xf32> to vector<1x256xf32>
    %3 = arith.mulf %1, %2 : vector<1x256xf32>
    %4 = vector.extract_strided_slice %0 {offsets = [1, 0], sizes = [1, 256], strides = [1, 1]} : vector<3x256xf32> to vector<1x256xf32>
    %5 = vector.extract_strided_slice %0 {offsets = [1, 0], sizes = [1, 256], strides = [1, 1]} : vector<3x256xf32> to vector<1x256xf32>
    %6 = arith.mulf %4, %5 : vector<1x256xf32>
    %7 = arith.addf %3, %6 : vector<1x256xf32>
    %8 = vector.extract_strided_slice %0 {offsets = [2, 0], sizes = [1, 256], strides = [1, 1]} : vector<3x256xf32> to vector<1x256xf32>
    %9 = vector.extract_strided_slice %0 {offsets = [2, 0], sizes = [1, 256], strides = [1, 1]} : vector<3x256xf32> to vector<1x256xf32>
    %10 = arith.mulf %8, %9 : vector<1x256xf32>
    %11 = arith.addf %7, %10 : vector<1x256xf32>
    %cst = arith.constant 1.000000e-24 : f32
    %12 = vector.broadcast %cst : f32 to vector<1x256xf32>
    %13 = arith.maximumf %11, %12 : vector<1x256xf32>
    %14 = math.rsqrt %13 : vector<1x256xf32>
    %15 = vector.broadcast %14 : vector<1x256xf32> to vector<3x256xf32>
    %16 = arith.mulf %0, %15 : vector<3x256xf32>
    %c0_1 = arith.constant 0 : index
    %c0_2 = arith.constant 0 : index
    %17 = vector.load %arg4[%c0_1, %c0_2] : memref<3x256xf32, #tpu.memory_space<vmem>>, vector<3x256xf32>
    tpu.vector_store %arg4[%c0_1, %c0_2], %16 {strides = array<i32>} : memref<3x256xf32, #tpu.memory_space<vmem>>, vector<3x256xf32>,
    %c0_3 = arith.constant 0 : index
    %c0_4 = arith.constant 0 : index
    %18 = vector.load %arg2[%c0_3, %c0_4] : memref<3x256xf32, #tpu.memory_space<vmem>>, vector<3x256xf32>
    %19 = vector.extract_strided_slice %18 {offsets = [0, 0], sizes = [1, 256], strides = [1, 1]} : vector<3x256xf32> to vector<1x256xf32>
    %20 = vector.extract_strided_slice %18 {offsets = [0, 0], sizes = [1, 256], strides = [1, 1]} : vector<3x256xf32> to vector<1x256xf32>
    %21 = arith.mulf %19, %20 : vector<1x256xf32>
    %22 = vector.extract_strided_slice %18 {offsets = [1, 0], sizes = [1, 256], strides = [1, 1]} : vector<3x256xf32> to vector<1x256xf32>
    %23 = vector.extract_strided_slice %18 {offsets = [1, 0], sizes = [1, 256], strides = [1, 1]} : vector<3x256xf32> to vector<1x256xf32>
    %24 = arith.mulf %22, %23 : vector<1x256xf32>
    %25 = arith.addf %21, %24 : vector<1x256xf32>
    %26 = vector.extract_strided_slice %18 {offsets = [2, 0], sizes = [1, 256], strides = [1, 1]} : vector<3x256xf32> to vector<1x256xf32>
    %27 = vector.extract_strided_slice %18 {offsets = [2, 0], sizes = [1, 256], strides = [1, 1]} : vector<3x256xf32> to vector<1x256xf32>
    %28 = arith.mulf %26, %27 : vector<1x256xf32>
    %29 = arith.addf %25, %28 : vector<1x256xf32>
    %cst_5 = arith.constant 1.000000e-24 : f32
    %30 = vector.broadcast %cst_5 : f32 to vector<1x256xf32>
    %31 = arith.maximumf %29, %30 : vector<1x256xf32>
    %32 = math.rsqrt %31 : vector<1x256xf32>
    %33 = vector.broadcast %32 : vector<1x256xf32> to vector<3x256xf32>
    %34 = arith.mulf %18, %33 : vector<3x256xf32>
    %c0_6 = arith.constant 0 : index
    %c0_7 = arith.constant 0 : index
    %35 = vector.load %arg5[%c0_6, %c0_7] : memref<3x256xf32, #tpu.memory_space<vmem>>, vector<3x256xf32>
    tpu.vector_store %arg5[%c0_6, %c0_7], %34 {strides = array<i32>} : memref<3x256xf32, #tpu.memory_space<vmem>>, vector<3x256xf32>,
    %c0_8 = arith.constant 0 : index
    %c0_9 = arith.constant 0 : index
    %36 = vector.load %arg3[%c0_8, %c0_9] : memref<3x256xf32, #tpu.memory_space<vmem>>, vector<3x256xf32>
    %37 = vector.extract_strided_slice %36 {offsets = [0, 0], sizes = [1, 256], strides = [1, 1]} : vector<3x256xf32> to vector<1x256xf32>
    %38 = vector.extract_strided_slice %36 {offsets = [0, 0], sizes = [1, 256], strides = [1, 1]} : vector<3x256xf32> to vector<1x256xf32>
    %39 = arith.mulf %37, %38 : vector<1x256xf32>
    %40 = vector.extract_strided_slice %36 {offsets = [1, 0], sizes = [1, 256], strides = [1, 1]} : vector<3x256xf32> to vector<1x256xf32>
    %41 = vector.extract_strided_slice %36 {offsets = [1, 0], sizes = [1, 256], strides = [1, 1]} : vector<3x256xf32> to vector<1x256xf32>
    %42 = arith.mulf %40, %41 : vector<1x256xf32>
    %43 = arith.addf %39, %42 : vector<1x256xf32>
    %44 = vector.extract_strided_slice %36 {offsets = [2, 0], sizes = [1, 256], strides = [1, 1]} : vector<3x256xf32> to vector<1x256xf32>
    %45 = vector.extract_strided_slice %36 {offsets = [2, 0], sizes = [1, 256], strides = [1, 1]} : vector<3x256xf32> to vector<1x256xf32>
    %46 = arith.mulf %44, %45 : vector<1x256xf32>
    %47 = arith.addf %43, %46 : vector<1x256xf32>
    %cst_10 = arith.constant 1.000000e-24 : f32
    %48 = vector.broadcast %cst_10 : f32 to vector<1x256xf32>
    %49 = arith.maximumf %47, %48 : vector<1x256xf32>
    %50 = math.rsqrt %49 : vector<1x256xf32>
    %51 = vector.broadcast %50 : vector<1x256xf32> to vector<3x256xf32>
    %52 = arith.mulf %36, %51 : vector<3x256xf32>
    %c0_11 = arith.constant 0 : index
    %c0_12 = arith.constant 0 : index
    %53 = vector.load %arg6[%c0_11, %c0_12] : memref<3x256xf32, #tpu.memory_space<vmem>>, vector<3x256xf32>
    tpu.vector_store %arg6[%c0_11, %c0_12], %52 {strides = array<i32>} : memref<3x256xf32, #tpu.memory_space<vmem>>, vector<3x256xf32>,
    return
  }
  func.func @transform_0(%arg0: i32) -> (i32, i32) {
    %c0_i32 = arith.constant 0 : i32
    %c0_i32_0 = arith.constant 0 : i32
    return %c0_i32, %arg0 : i32, i32
  }
  func.func @transform_1(%arg0: i32) -> (i32, i32) {
    %c0_i32 = arith.constant 0 : i32
    %c0_i32_0 = arith.constant 0 : i32
    return %c0_i32, %arg0 : i32, i32
  }
  func.func @transform_2(%arg0: i32) -> (i32, i32) {
    %c0_i32 = arith.constant 0 : i32
    %c0_i32_0 = arith.constant 0 : i32
    return %c0_i32, %arg0 : i32, i32
  }
  func.func @transform_3(%arg0: i32) -> (i32, i32) {
    %c0_i32 = arith.constant 0 : i32
    %c0_i32_0 = arith.constant 0 : i32
    return %c0_i32, %arg0 : i32, i32
  }
  func.func @transform_4(%arg0: i32) -> (i32, i32) {
    %c0_i32 = arith.constant 0 : i32
    %c0_i32_0 = arith.constant 0 : i32
    return %c0_i32, %arg0 : i32, i32
  }
  func.func @transform_5(%arg0: i32) -> (i32, i32) {
    %c0_i32 = arith.constant 0 : i32
    %c0_i32_0 = arith.constant 0 : i32
    return %c0_i32, %arg0 : i32, i32
  }
}

</mosaic_0001>

<bundles_post_ra>
// kernel: tpu_custom_call.1
= control target key start
LH: loop header
LB: loop body
LE: loop exit
PB: predicated region body
PF: predicated region fallthrough
CT: control target
= control target key end

     0   :  { %s1330_s0 = inlined_call_operand.hbm [shape: f32[3,512], index: 0, kind: input, shape index: {}]   ;;  %s1331_s1 = inlined_call_operand.hbm [shape: f32[3,512], index: 1, kind: input, shape index: {}]   ;;  %s1332_s2 = inlined_call_operand.hbm [shape: f32[3,512], index: 2, kind: input, shape index: {}]   ;;  %s1333_s3 = inlined_call_operand.hbm [shape: f32[3,512], index: 3, kind: output, shape index: {0}]   ;;  %s1334_s4 = inlined_call_operand.hbm [shape: f32[3,512], index: 4, kind: output, shape index: {1}]   ;;  %s1335_s5 = inlined_call_operand.hbm [shape: f32[3,512], index: 5, kind: output, shape index: {2}]  }
   0x1   :  { %1343 = sst [smem:[#allocation19_spill]] %s1330_s0 }
   0x2   :  { %1344 = sst [smem:[#allocation20_spill]] %s1331_s1 }
   0x3   :  { %11 = vsyncpa [#allocation3], 0 }
   0x4   :  { %13 = vsyncpa [#allocation3 + $0x1], 0 }
   0x5   :  { %14 = vsyncpa [#allocation6], 0 }
   0x6   :  { %16 = vsyncpa [#allocation6 + $0x1], 0 }
   0x7   :  { %17 = vsyncpa [#allocation4], 0 }
   0x8   :  { %19 = vsyncpa [#allocation4 + $0x1], 0 }
   0x9   :  { %20 = vsyncpa [#allocation10], 0 }
   0xa   :  { %22 = vsyncpa [#allocation10 + $0x1], 0  ;;  %s1039_s18 = smov 0   ;;  %s1041_s19 = smov 0  }
   0xb   :  { %s1043_s20 = smov 0   ;;  %s1045_s21 = smov 0  }
   0xc LB: > { %1345 = sst [smem:[#allocation16_spill]] %s997_s20  ;;  %s1060_s22 = sadd.s32 4294967295, %s1001_s21   ;;  %s1001_s21 = sphi %s1045_s21, %s1364_s21   ;;  %s997_s20 = sphi %s1043_s20, %s1369_s20   ;;  %s993_s19 = sphi %s1041_s19, %s1368_s19   ;;  %s989_s18 = sphi %s1039_s18, %s1367_s18  }
   0xd   : > { %s1336_s23 = sadd.s32 4294967294, %s1001_s21   ;;  %s1064_s24 = sadd.s32 1, %s1001_s21  }
   0xe   : > { %1346 = sst [smem:[#allocation17_spill]] %s1064_s24  ;;  %s35_s25 = sadd.s32 1, %s997_s20 }
   0xf   : > { %s32_s26 = ssub.s32 %s1001_s21, %s1064_s24  ;;  %p42_p0 = scmp.ne.s32.totalorder %s997_s20, %s993_s19 }
  0x10   : > { %p33_p1 = scmp.eq.s32.totalorder %s32_s26, 0  ;;  %p43_p2 = scmp.eq.s32.totalorder %s1001_s21, 0 }
  0x11   : > { %p48_p3 = scmp.ne.s32.totalorder %s993_s19, %s989_s18  ;;  %p49_p4 = scmp.eq.s32.totalorder %s1060_s22, 0 }
  0x12   : > { %s1076_s27 = scalar_select %p33_p1, %s997_s20, %s35_s25  }
  0x13   : > { %p44_p5 = por %p43_p2, %p42_p0  ;;  %p1078_p6 = por %p49_p4, %p48_p3 }
  0x14   : > { %1347 = sst [smem:[#allocation18_spill]] %s1076_s27  ;;  %p124_p7 = scmp.eq.s32.totalorder %s1060_s22, 1 }
  0x15   : > { %s1348_s28 = scalar_select %p1078_p6, 1, 0 }
  0x16   : > { %p130_p8 = scmp.eq.s32.totalorder %s1336_s23, 1  ;;  %p753_p10 = scmp.lt.s32.totalorder %s1001_s21, 2 }
  0x17   : > { %p1087_p11 = por %p124_p7, %p42_p0  ;;  %s1337_s6 = sand.u32 1, %s997_s20  }
  0x18   : > { %p1091_p12 = por %p130_p8, %p48_p3  ;;  %s1097_s7 = sshll.u32 %s1001_s21, 7 }
  0x19   : > { %s1349_s29 = scalar_select %p1087_p11, 1, 0 }
  0x1a   : > { %s1350_s30 = scalar_select %p1091_p12, 1, 0 }
  0x1b   : > { %s1101_s8 = sshll.u32 %s1337_s6, 3  ;;  %p1103_p13 = pnand %p753_p10, %p44_p5 }
  0x1c   : > { %s221_s10 = sand.u32 1, %s1001_s21   ;;  %s1352_s1 = sld [smem:[#allocation20_spill]] }
  0x1d   : > { %s225_s14 = scalar_lea.vmem [#allocation5], %s1101_s8  ;;  %s1116_s16 = scalar_lea.sflag [#allocation6], %s221_s10 }
  0x1e   : > { %s233_s15 = sshll.u32 %s225_s14, 4  ;;  %p1122_p2 = pneg %p1103_p13  ;;  %s234_s15 = int_to_ptr.vmem [resolvable:$true] %s233_s15 }
  0x22   : > { %s1112_s13 = scalar_lea.hbm %s1352_s1, %s1097_s7  ;;  %s798_s12 = scalar_lea.hbm %s1352_s1, 256 }
  0x23   : > { %s793_s17 = scalar_lea.hbm %s1112_s13, 128  ;;  %p799_p5 = scmp.lt.s32.totalorder %s1112_s13, %s1352_s1 }
  0x24   : > { %p794_p1 = scmp.ne.s32.totalorder %s1112_s13, %s793_s17  ;;  %p800_p7 = scmp.lt.s32.totalorder %s798_s12, %s793_s17 }
  0x26   : > { %p796_p3 = pnand %p1122_p2, %p794_p1  ;;  %p801_p8 = por %p800_p7, %p799_p5 }
  0x28   : > { %p797_p4 = pneg %p796_p3 }
  0x2a   : > { %p802_p10 = pnand %p801_p8, %p797_p4 }
  0x2c   : > { %805 = shalt.err (!%p802_p10)
}
  0x2d   : > { %s806_s10 = scalar_lea.vmem %s234_s15, 128  ;;  %s1003_s6 = smov [#allocation5]  }
  0x2e   : > { %p807_p9 = scmp.ne.s32.totalorder %s234_s15, %s806_s10  ;;  %s811_s27 = sshll.u32 %s1003_s6, 4  ;;  %s812_s27 = int_to_ptr.vmem [resolvable:$false] %s811_s27 }
  0x2f   : > { %s813_s24 = scalar_lea.vmem %s812_s27, 256  ;;  %p814_p1 = scmp.lt.s32.totalorder %s234_s15, %s812_s27 }
  0x30   : > { %p809_p0 = pnand %p807_p9, %p1122_p2  ;;  %p815_p3 = scmp.lt.s32.totalorder %s813_s24, %s806_s10 }
  0x32   : > { %p810_p12 = pneg %p809_p0  ;;  %p816_p11 = por %p815_p3, %p814_p1 }
  0x34   : > { %p817_p6 = pnand %p816_p11, %p810_p12 }
  0x36   : > { %820 = shalt.err (!%p817_p6)
}
  0x37   : > { %739 = dma.hbm_to_vmem [thread:$0]  (!%p1103_p13), %s1112_s13, 128, %s234_s15, %s1116_s16  }
  0x38   : > { %p257_p9 = scmp.lt.s32.totalorder %s1001_s21, 3  ;;  %s1354_s0 = sld [smem:[#allocation19_spill]] }
  0x39   : > { %p1355_p0 = scmp.ge.s32.totalorder %s1001_s21, 1  ;;  %s206_s17 = scalar_lea.vmem [#allocation2], %s1101_s8 }
  0x3a   : > { %s214_s26 = sshll.u32 %s206_s17, 4  ;;  %s1357_s11 = sand.u32 1, %s997_s20   ;;  %s215_s26 = int_to_ptr.vmem [resolvable:$true] %s214_s26 }
  0x3b   : > { %p1150_p6 = pnand %p1355_p0, %p257_p9  ;;  %s203_s12 = scalar_lea.sflag [#allocation3], %s1357_s11 }
  0x3d   : > { %s1356_s24 = scalar_select %p1150_p6, 1, 0 }
  0x3e   : > { %s1146_s27 = scalar_lea.hbm %s1354_s0, %s1097_s7  ;;  %s826_s10 = scalar_lea.hbm %s1354_s0, 256 }
  0x3f   : > { %s821_s13 = scalar_lea.hbm %s1146_s27, 128  ;;  %p827_p5 = scmp.lt.s32.totalorder %s1146_s27, %s1354_s0 }
  0x40   : > { %p822_p11 = scmp.ne.s32.totalorder %s1146_s27, %s821_s13  ;;  %p828_p7 = scmp.lt.s32.totalorder %s826_s10, %s821_s13 }
  0x42   : > { %p824_p12 = pnand %p822_p11, %p1122_p2  ;;  %p829_p8 = por %p828_p7, %p827_p5 }
  0x44   : > { %p825_p4 = pneg %p824_p12 }
  0x46   : > { %p830_p10 = pnand %p829_p8, %p825_p4 }
  0x48   : > { %833 = shalt.err (!%p830_p10)
}
  0x49   : > { %s834_s17 = scalar_lea.vmem %s215_s26, 128  ;;  %s1004_s11 = smov [#allocation2]  }
  0x4a   : > { %p835_p1 = scmp.ne.s32.totalorder %s215_s26, %s834_s17  ;;  %s839_s1 = sshll.u32 %s1004_s11, 4  ;;  %s840_s1 = int_to_ptr.vmem [resolvable:$false] %s839_s1 }
  0x4b   : > { %s841_s20 = scalar_lea.vmem %s840_s1, 256  ;;  %p842_p0 = scmp.lt.s32.totalorder %s215_s26, %s840_s1 }
  0x4c   : > { %p837_p3 = pnand %p835_p1, %p1122_p2  ;;  %p843_p11 = scmp.lt.s32.totalorder %s841_s20, %s834_s17 }
  0x4e   : > { %p838_p9 = pneg %p837_p3  ;;  %p844_p12 = por %p843_p11, %p842_p0 }
  0x50   : > { %p845_p6 = pnand %p844_p12, %p838_p9 }
  0x52   : > { %848 = shalt.err (!%p845_p6)
}
  0x53   : > { %736 = dma.hbm_to_vmem [thread:$0]  (!%p1103_p13), %s1146_s27, 128, %s215_s26, %s203_s12  }
  0x54   : > { %s250_s14 = scalar_lea.hbm %s1332_s2, %s1097_s7  ;;  %s244_s10 = scalar_lea.vmem [#allocation7], %s1101_s8 }
  0x55   : > { %s252_s23 = sshll.u32 %s244_s10, 4  ;;  %s849_s6 = scalar_lea.hbm %s250_s14, 128  ;;  %s253_s23 = int_to_ptr.vmem [resolvable:$true] %s252_s23 }
  0x56   : > { %p850_p4 = scmp.ne.s32.totalorder %s250_s14, %s849_s6  ;;  %s854_s17 = scalar_lea.hbm %s1332_s2, 256 }
  0x57   : > { %p855_p6 = scmp.lt.s32.totalorder %s250_s14, %s1332_s2  ;;  %p856_p8 = scmp.lt.s32.totalorder %s854_s17, %s849_s6 }
  0x58   : > { %p852_p5 = pnand %p850_p4, %p1122_p2 }
  0x59   : > { %p857_p10 = por %p856_p8, %p855_p6 }
  0x5a   : > { %p853_p7 = pneg %p852_p5 }
  0x5c   : > { %p858_p1 = pnand %p857_p10, %p853_p7 }
  0x5e   : > { %861 = shalt.err (!%p858_p1)
}
  0x5f   : > { %s862_s7 = scalar_lea.vmem %s253_s23, 128  ;;  %s1005_s8 = smov [#allocation7]  }
  0x60   : > { %p863_p3 = scmp.ne.s32.totalorder %s253_s23, %s862_s7  ;;  %s867_s27 = sshll.u32 %s1005_s8, 4  ;;  %s868_s27 = int_to_ptr.vmem [resolvable:$false] %s867_s27 }
  0x61   : > { %s869_s26 = scalar_lea.vmem %s868_s27, 256  ;;  %p870_p11 = scmp.lt.s32.totalorder %s253_s23, %s868_s27 }
  0x62   : > { %p865_p9 = pnand %p863_p3, %p1122_p2  ;;  %p871_p12 = scmp.lt.s32.totalorder %s869_s26, %s862_s7 }
  0x64   : > { %p866_p0 = pneg %p865_p9  ;;  %p872_p4 = por %p871_p12, %p870_p11 }
  0x66   : > { %p873_p5 = pnand %p872_p4, %p866_p0 }
  0x68   : > { %876 = shalt.err (!%p873_p5)
}
  0x69   : > { %742 = dma.hbm_to_vmem [thread:$0]  (!%p1103_p13), %s250_s14, 128, %s253_s23, %s1116_s16  }
  0x6a   : > { %p1358_p7 = scmp.ne.s32.totalorder %s1356_s24, 0 }
  0x6b   : > { %s1194_s0 = sand.u32 (!%p1358_p7), 1, %s993_s19   ;;  %p1359_p2 = scmp.ne.s32.totalorder (!%p1358_p7), %s1348_s28, 0 }
  0x6c   : > { %261 = sbr.rel (%p1358_p7) target bundleno = 212 (0xd4), region = 32  ;;  %s1197_s25 = sshll.u32 (!%p1358_p7), %s1194_s0, 3 }
  0x6d   : > { %s264_s12 = scalar_lea.sflag (!%p1358_p7), [#allocation3], %s1194_s0  ;;  %s267_s13 = scalar_lea.vmem (!%p1358_p7), [#allocation2], %s1197_s25 }
  0x71   : > { %972 = dma.done.wait (%p1359_p2), %s264_s12, 128  }
  0x72   : > { %974 = vsyncadd (%p1359_p2), %s264_s12, 4294967168  ;;  %s272_s9 = sand.u32 1, %s1060_s22   ;;  %s276_s24 = scalar_lea.vmem [#allocation5], %s1197_s25 }
  0x73   : > { %s273_s16 = scalar_lea.sflag [#allocation6], %s272_s9 }
  0x74   : > { %976 = dma.done.wait (%p1359_p2), %s273_s16, 256  }
  0x75   : > { %978 = vsyncadd (%p1359_p2), %s273_s16, 4294967040  ;;  %v376_v0 = vld [vmem:[%s276_s24] sm:$0x77]  ;;  %v338_v1 = vld [vmem:[%s267_s13] sm:$0x77]  ;;  %s285_s15 = scalar_lea.vmem [#allocation7], %s1197_s25  ;;  %v352_v21 = vlaneseq }
  0x76   : > { %v414_v2 = vld [vmem:[%s285_s15] sm:$0x77]  ;;  %v377_v3 = vmul.f32 %v376_v0, %v376_v0  ;;  %v339_v4 = vmul.f32 %v338_v1, %v338_v1  ;;  %s324_s28 = scalar_lea.vmem [#allocation9], %s1197_s25  ;;  %s317_s10 = scalar_lea.vmem [#allocation8], %s1197_s25 }
  0x77   : > { %v415_v5 = vmul.f32 %v414_v2, %v414_v2  ;;  %v353_v22 = vshrl.u32 %v352_v21, 7  ;;  %s491_s14 = sshll.u32 %s324_s28, 4  ;;  %s477_s23 = sshll.u32 %s317_s10, 4  ;;  %s1217_s14 = int_to_ptr.vmem [resolvable:$true] %s491_s14  ;;  %s1219_s23 = int_to_ptr.vmem [resolvable:$true] %s477_s23 }
  0x78   : > { %v700_v6 = vrot.slane %v377_v3, 9  ;;  %v701_v7 = vrot.slane %v377_v3, 10  ;;  %v698_v8 = vrot.slane %v339_v4, 9  ;;  %v699_v9 = vrot.slane %v339_v4, 10  ;;  %s718_s6 = sshll.u32 %s1060_s22, 7  ;;  %s331_s1 = scalar_lea.vmem [#allocation11], %s1197_s25 }
  0x79   : > { %v702_v10 = vrot.slane %v415_v5, 9  ;;  %v703_v11 = vrot.slane %v415_v5, 10  ;;  %v354_v23 = vsub.s32 0, %v353_v22  ;;  %v358_v24 = vsub.s32 4, %v353_v22  ;;  %s505_s20 = sshll.u32 %s331_s1, 4  ;;  %s1227_s7 = scalar_lea.hbm %s1334_s4, %s718_s6  ;;  %s1234_s20 = int_to_ptr.vmem [resolvable:$true] %s505_s20 }
  0x7a   : > { %v382_v12 = vadd.f32 %v700_v6, %v377_v3  ;;  %v344_v13 = vadd.f32 %v698_v8, %v339_v4  ;;  %s1232_s26 = scalar_lea.hbm %s1333_s3, %s718_s6  ;;  %s1239_s16 = scalar_lea.hbm %s1335_s5, %s718_s6 }
  0x7b   : > { %v420_v14 = vadd.f32 %v702_v10, %v415_v5  ;;  %s1243_s24 = scalar_lea.sflag [#allocation10], %s272_s9  ;;  %s877_s15 = scalar_lea.vmem %s1217_s14, 128 }
  0x7c   : > { %v386_v15 = vadd.f32 %v701_v7, %v382_v12  ;;  %v348_v16 = vadd.f32 %v699_v9, %v344_v13  ;;  %p878_p13 = scmp.ne.s32.totalorder %s1217_s14, %s877_s15  ;;  %p1360_p6 = scmp.ne.s32.totalorder %s1349_s29, 0 }
  0x7d   : > { %v424_v17 = vadd.f32 %v703_v11, %v420_v14  ;;  %s1006_s17 = smov [#allocation9]  }
  0x7e   : > { %v387_v18 = vmax.f32 %v386_v15, 1e-24  ;;  %v349_v19 = vmax.f32 %v348_v16, 1e-24  ;;  %p879_p8 = pnand %p878_p13, %p1360_p6  ;;  %s881_s11 = sshll.u32 %s1006_s17, 4  ;;  %s882_s11 = int_to_ptr.vmem [resolvable:$false] %s881_s11 }
  0x7f   : > { %v425_v20 = vmax.f32 %v424_v17, 1e-24  ;;  %p884_p1 = scmp.lt.s32.totalorder %s1217_s14, %s882_s11 }
  0x80   : > { %787 = vrsqrt.f32 %v387_v18  ;;  %p880_p10 = pneg %p879_p8 }
  0x81   : > { %789 = vrsqrt.f32 %v349_v19 }
  0x82   : > { %791 = vrsqrt.f32 %v425_v20 }
  0x8d   : > { %v788_v25 = vpop.eup %787 }
  0x8e   : > { %v790_v26 = vpop.eup %789  ;;  %v393_v27 = vrot.slane %v788_v25, %v354_v23  ;;  %v397_v28 = vrot.slane %v788_v25, %v358_v24 }
  0x8f   : > { %v792_v29 = vpop.eup %791  ;;  %v355_v30 = vrot.slane %v790_v26, %v354_v23  ;;  %v359_v31 = vrot.slane %v790_v26, %v358_v24 }
  0x90   : > { %v403_v32 = vrot.slane %v393_v27, %v354_v23  ;;  %v407_v33 = vrot.slane %v397_v28, %v354_v23  ;;  %v431_v34 = vrot.slane %v792_v29, %v354_v23  ;;  %v435_v35 = vrot.slane %v792_v29, %v358_v24 }
  0x91   : > { %v365_v36 = vrot.slane %v355_v30, %v354_v23  ;;  %v369_v37 = vrot.slane %v359_v31, %v354_v23 }
  0x92   : > { %v410_v38 = vcombine.low %v403_v32, %v407_v33  ;;  %v441_v39 = vrot.slane %v431_v34, %v354_v23  ;;  %v445_v40 = vrot.slane %v435_v35, %v354_v23 }
  0x93   : > { %v372_v41 = vcombine.low %v365_v36, %v369_v37 }
  0x94   : > { %v412_v42 = vmul.f32 %v410_v38, %v376_v0  ;;  %v448_v43 = vcombine.low %v441_v39, %v445_v40 }
  0x95   : > { %v374_v44 = vmul.f32 %v372_v41, %v338_v1 }
  0x96   : > { %413 = vst [vmem:[%s324_s28] sm:$0x77] %v412_v42  ;;  %v450_v45 = vmul.f32 %v448_v43, %v414_v2  ;;  %s883_s28 = scalar_lea.vmem %s882_s11, 256 }
  0x97   : > { %375 = vst [vmem:[%s317_s10] sm:$0x77] %v374_v44  ;;  %p885_p3 = scmp.lt.s32.totalorder %s883_s28, %s877_s15 }
  0x99   : > { %p886_p9 = por %p885_p3, %p884_p1 }
  0x9b   : > { %p887_p0 = pnand %p886_p9, %p880_p10 }
  0x9d   : > { %890 = shalt.err (!%p887_p0)
}
  0x9e   : > { %s891_s22 = scalar_lea.hbm %s1227_s7, 128  ;;  %s895_s6 = scalar_lea.hbm %s1334_s4, 256 }
  0x9f   : > { %p892_p11 = scmp.ne.s32.totalorder %s1227_s7, %s891_s22  ;;  %p896_p5 = scmp.lt.s32.totalorder %s1227_s7, %s1334_s4 }
  0xa0   : > { %p897_p7 = scmp.lt.s32.totalorder %s895_s6, %s891_s22 }
  0xa1   : > { %p893_p12 = pnand %p892_p11, %p1360_p6 }
  0xa2   : > { %p898_p2 = por %p897_p7, %p896_p5 }
  0xa3   : > { %p894_p4 = pneg %p893_p12 }
  0xa5   : > { %p899_p13 = pnand %p898_p2, %p894_p4 }
  0xa7   : > { %902 = shalt.err (!%p899_p13)
}
  0xa8   : > { %728 = dma.vmem_to_hbm [thread:$0]  (%p1360_p6), %s1217_s14, 128, %s1227_s7, %s1243_s24   ;;  %451 = vst [vmem:[%s331_s1] sm:$0x77] %v450_v45 }
  0xa9   : > { %s453_s12 = scalar_lea.sflag [#allocation4], %s1194_s0  ;;  %s903_s13 = scalar_lea.vmem %s1219_s23, 128 }
  0xaa   : > { %p904_p8 = scmp.ne.s32.totalorder %s1219_s23, %s903_s13  ;;  %s1007_s15 = smov [#allocation8]  }
  0xab   : > { %s907_s17 = sshll.u32 %s1007_s15, 4  ;;  %s908_s17 = int_to_ptr.vmem [resolvable:$false] %s907_s17 }
  0xac   : > { %p905_p10 = pnand %p904_p8, %p1360_p6  ;;  %s909_s11 = scalar_lea.vmem %s908_s17, 256 }
  0xad   : > { %p910_p3 = scmp.lt.s32.totalorder %s1219_s23, %s908_s17  ;;  %p911_p9 = scmp.lt.s32.totalorder %s909_s11, %s903_s13 }
  0xae   : > { %p906_p1 = pneg %p905_p10 }
  0xaf   : > { %p912_p0 = por %p911_p9, %p910_p3 }
  0xb1   : > { %p913_p11 = pnand %p912_p0, %p906_p1 }
  0xb3   : > { %916 = shalt.err (!%p913_p11)
}
  0xb4   : > { %s917_s25 = scalar_lea.hbm %s1232_s26, 128  ;;  %s921_s1 = scalar_lea.hbm %s1333_s3, 256 }
  0xb5   : > { %p918_p12 = scmp.ne.s32.totalorder %s1232_s26, %s917_s25  ;;  %p922_p7 = scmp.lt.s32.totalorder %s1232_s26, %s1333_s3 }
  0xb6   : > { %p923_p2 = scmp.lt.s32.totalorder %s921_s1, %s917_s25 }
  0xb7   : > { %p919_p4 = pnand %p918_p12, %p1360_p6 }
  0xb8   : > { %p924_p13 = por %p923_p2, %p922_p7 }
  0xb9   : > { %p920_p5 = pneg %p919_p4 }
  0xbb   : > { %p925_p8 = pnand %p924_p13, %p920_p5 }
  0xbd   : > { %928 = shalt.err (!%p925_p8)
}
  0xbe   : > { %727 = dma.vmem_to_hbm [thread:$0]  (%p1360_p6), %s1219_s23, 128, %s1232_s26, %s453_s12  }
  0xbf   : > { %s929_s22 = scalar_lea.vmem %s1234_s20, 128  ;;  %s1008_s9 = smov [#allocation11]  }
  0xc0   : > { %p930_p10 = scmp.ne.s32.totalorder %s1234_s20, %s929_s22  ;;  %s933_s10 = sshll.u32 %s1008_s9, 4  ;;  %s934_s10 = int_to_ptr.vmem [resolvable:$false] %s933_s10 }
  0xc1   : > { %s935_s6 = scalar_lea.vmem %s934_s10, 256  ;;  %p936_p9 = scmp.lt.s32.totalorder %s1234_s20, %s934_s10 }
  0xc2   : > { %p931_p1 = pnand %p930_p10, %p1360_p6  ;;  %p937_p0 = scmp.lt.s32.totalorder %s935_s6, %s929_s22 }
  0xc4   : > { %p932_p3 = pneg %p931_p1  ;;  %p938_p11 = por %p937_p0, %p936_p9 }
  0xc6   : > { %p939_p12 = pnand %p938_p11, %p932_p3 }
  0xc8   : > { %942 = shalt.err (!%p939_p12)
}
  0xc9   : > { %s943_s8 = scalar_lea.hbm %s1239_s16, 128  ;;  %s947_s27 = scalar_lea.hbm %s1335_s5, 256 }
  0xca   : > { %p944_p4 = scmp.ne.s32.totalorder %s1239_s16, %s943_s8  ;;  %p948_p2 = scmp.lt.s32.totalorder %s1239_s16, %s1335_s5 }
  0xcb   : > { %p949_p13 = scmp.lt.s32.totalorder %s947_s27, %s943_s8 }
  0xcc   : > { %p945_p5 = pnand %p944_p4, %p1360_p6 }
  0xcd   : > { %p950_p8 = por %p949_p13, %p948_p2 }
  0xce   : > { %p946_p7 = pneg %p945_p5 }
  0xd0   : > { %p951_p10 = pnand %p950_p8, %p946_p7 }
  0xd2   : > { %954 = shalt.err (!%p951_p10)
}
  0xd3   : > { %729 = dma.vmem_to_hbm [thread:$0]  (%p1360_p6), %s1234_s20, 128, %s1239_s16, %s1243_s24  }
  0xd4 PF: > { %s517_s15 = sand.u32 1, %s989_s18   ;;  %p1361_p1 = scmp.ne.s32.totalorder %s1350_s30, 0 }
  0xd5   : > { %p1362_p3 = scmp.ge.s32.totalorder %s1001_s21, 2  ;;  %s518_s17 = scalar_lea.sflag [#allocation4], %s517_s15 }
  0xd7   : > { %p744_p9 = pnand %p1362_p3, %p1361_p1 }
  0xd9   : > { %p745_p0 = pneg %p744_p9 }
  0xdb   : > { %980 = dma.done.wait (%p745_p0), %s518_s17, 128  }
  0xdc   : > { %982 = vsyncadd (%p745_p0), %s518_s17, 4294967168  ;;  %s1363_s11 = sadd.s32 4294967294, %s1001_s21  }
  0xdd   : > { %s526_s25 = sand.u32 1, %s1363_s11  }
  0xde   : > { %s527_s29 = scalar_lea.sflag [#allocation10], %s526_s25 }
  0xdf   : > { %984 = dma.done.wait (%p745_p0), %s527_s29, 256  }
  0xe0   : > { %986 = vsyncadd (%p745_p0), %s527_s29, 4294967040  ;;  %s1364_s21 = sld [smem:[#allocation17_spill]]  ;;  %s1367_s18 = smov %s993_s19 }
  0xe1   : > { %s1365_s20 = sld [smem:[#allocation16_spill]] }
  0xe2   : > { %s1366_s16 = sld [smem:[#allocation18_spill]] }
  0xe6   : > { %p25_p6 = scmp.ge.s32.totalorder %s1364_s21, 4  }
  0xe7   : > { %s1368_s19 = smov %s1365_s20 }
  0xe8   : > { %s1369_s20 = smov %s1366_s16  ;;  %27 = sbr.rel (!%p25_p6) target bundleno = 12 (0xc), region = 133 }
  0xed   :  { %541 = vsyncpa [#allocation3], 1 }
  0xee   :  { %543 = vsyncpa [#allocation3 + $0x1], 1 }
  0xef   :  { %544 = vsyncpa [#allocation6], 1 }
  0xf0   :  { %546 = vsyncpa [#allocation6 + $0x1], 1 }
  0xf1   :  { %547 = vsyncpa [#allocation4], 1 }
  0xf2   :  { %549 = vsyncpa [#allocation4 + $0x1], 1 }
  0xf3   :  { %550 = vsyncpa [#allocation10], 1 }
  0xf4   :  { %552 = vsyncpa [#allocation10 + $0x1], 1 }

</bundles_post_ra>
